<compile_context>
chip_gen: v7x
topology: tpu7x:2x2x1
jax: 0.10.0
libtpu: 0.0.40
codegen_flags: <defaults>
</compile_context>

<pallas_src>
import jax
import jax.numpy as jnp
import numpy as np
from jax import lax
from jax.experimental import pallas as pl
from jax.experimental.pallas import tpu as pltpu


# ------------------------------ small helpers ------------------------------ #
def _ceil_to(v, m):
    return ((v + m - 1) // m) * m


def _pair(v):
    if isinstance(v, (tuple, list)):
        a, b = v
        return int(a), int(b)
    return int(v), int(v)


def _vmem_capacity_bytes():
    try:
        return int(pltpu.get_tpu_info().vmem_capacity_bytes)
    except Exception:
        return 64 * 1024 * 1024      # conservative: v7x per-TensorCore VMEM


# pltpu.roll sign convention (jnp.roll-like: element i -> i+shift, vs. the
# opposite).  Probed once with a tiny eager kernel so the tap shift below is
# correct on any jax/Mosaic version.  Must run outside of jit (eager).
_ROLL_IS_JNP = None


def _roll_is_jnp_convention():
    global _ROLL_IS_JNP
    if _ROLL_IS_JNP is None:
        def probe(x_ref, o_ref):
            o_ref[...] = pltpu.roll(x_ref[...], shift=1, axis=1)

        x = lax.broadcasted_iota(jnp.int32, (8, 128), 1)
        y = pl.pallas_call(
            probe, out_shape=jax.ShapeDtypeStruct((8, 128), jnp.int32))(x)
        # jnp.roll convention: y[:,1] == x[:,0] == 0 ; opposite: y[:,1] == 2
        _ROLL_IS_JNP = bool(int(jax.device_get(y)[0, 1]) == 0)
    return _ROLL_IS_JNP


# ------------------------------ Pallas kernel ------------------------------ #
def _make_tap_kernel(taps, Wp, Fpad, roll_is_jnp):
    """Fused im2col conv kernel: per-tap matmul + lane rotation + f32 accum."""

    def kernel(x_ref, w_ref, o_ref, acc_ref):
        # x_ref  : [tcg, Fpad]    bf16  flattened padded input plane (lanes = Hp*Wp)
        # w_ref  : [T, toc, tcg]  bf16  per-tap weight matrices
        # o_ref  : [toc, Fpad]    f32   padded-plane output (cropped in XLA)
        # acc_ref: [toc, Fpad]    f32   accumulator across the Cg grid axis
        c = pl.program_id(3)

        @pl.when(c == 0)
        def _init():
            acc_ref[...] = jnp.zeros_like(acc_ref)

        x = x_ref[...]
        z = None
        for t, (di, dj) in enumerate(taps):
            zt = jnp.dot(w_ref[t], x, preferred_element_type=jnp.float32)
            d = di * Wp + dj
            if d:
                # Want zt_shift[:, f] = zt[:, f + d]; wrapped tail only lands in
                # flat positions that are cropped after the kernel.
                shift = (Fpad - d) if roll_is_jnp else d
                zt = pltpu.roll(zt, shift=shift, axis=1)
            z = zt if z is None else z + zt
        acc_ref[...] += z

        @pl.when(c == pl.num_programs(3) - 1)
        def _store():
            o_ref[...] = acc_ref[...].astype(o_ref.dtype)

    return kernel


def _plan_tiles(OCg, Cg, T, Fpad):
    """Pick OCg / Cg tile sizes from the per-generation VMEM budget."""
    vmem = _vmem_capacity_bytes()
    budget = int(vmem * 0.35)

    def footprint(toc, tcg):
        return (2 * tcg * Fpad * 2          # x block, double-buffered bf16
                + 2 * T * toc * tcg * 2     # w block, double-buffered bf16
                + 2 * toc * Fpad * 4        # out block, double-buffered f32
                + toc * Fpad * 4)           # accumulator scratch f32

    toc, tcg = OCg, Cg
    # Prefer full Cg (weights stay VMEM-resident, single K step) and full OCg;
    # shrink OCg tile first, then tile Cg, only if over budget.
    while footprint(toc, tcg) > budget and toc > 16:
        toc = max(16, _ceil_to(toc // 2, 16))
    while footprint(toc, tcg) > budget and tcg > 128:
        tcg = max(128, _ceil_to(tcg // 2, 128))
    toc = min(toc, OCg)
    tcg = min(tcg, Cg)
    ocg_pad = OCg if toc == OCg else _ceil_to(OCg, toc)
    cg_pad = Cg if tcg == Cg else _ceil_to(Cg, tcg)

    fp = footprint(toc, tcg)
    vmem_limit = min(int(vmem * 0.9), max(32 << 20, 3 * fp + (8 << 20)))
    return toc, tcg, ocg_pad, cg_pad, vmem_limit


# ------------------------------ fused conv2d ------------------------------- #
def _conv2d_fused(x, w, stride, padding, groups):
    """Cross-correlation conv2d (NCHW / OIHW) with im2col fused into the kernel."""
    N, C, H, W = x.shape
    OC, Cg, KH, KW = w.shape
    sh, sw = _pair(stride)
    ph, pw = _pair(padding)
    G = int(groups)
    assert C == Cg * G and OC % G == 0
    OCg = OC // G

    Hp, Wp = H + 2 * ph, W + 2 * pw
    Ho1, Wo1 = Hp - KH + 1, Wp - KW + 1        # stride-1 output extent
    assert Ho1 >= 1 and Wo1 >= 1, "kernel larger than padded input"
    Ho = (Hp - KH) // sh + 1
    Wo = (Wp - KW) // sw + 1
    T = KH * KW
    F = Hp * Wp
    Fpad = _ceil_to(F, 128)

    # XLA-side prep: bf16 cast + spatial pad + flatten + lane pad (~1.3x the
    # activation bytes, vs ~9x for a materialized im2col patches tensor).
    xp = x.astype(jnp.bfloat16)
    if ph or pw:
        xp = jnp.pad(xp, ((0, 0), (0, 0), (ph, ph), (pw, pw)))
    xf = xp.reshape(N, G, Cg, F)
    if Fpad != F:
        xf = jnp.pad(xf, ((0, 0), (0, 0), (0, 0), (0, Fpad - F)))

    # Weights -> [G, T, OCg, Cg] (tap-major so the kernel indexes w_ref[t]).
    wk = (w.astype(jnp.bfloat16)
           .reshape(G, OCg, Cg, T)
           .transpose(0, 3, 1, 2))

    toc, tcg, OCg_pad, Cg_pad, vmem_limit = _plan_tiles(OCg, Cg, T, Fpad)
    if OCg_pad != OCg:
        wk = jnp.pad(wk, ((0, 0), (0, 0), (0, OCg_pad - OCg), (0, 0)))
    if Cg_pad != Cg:
        wk = jnp.pad(wk, ((0, 0), (0, 0), (0, 0), (0, Cg_pad - Cg)))
        xf = jnp.pad(xf, ((0, 0), (0, 0), (0, Cg_pad - Cg), (0, 0)))

    grid = (N, G, OCg_pad // toc, Cg_pad // tcg)
    taps = [(t // KW, t % KW) for t in range(T)]
    kernel = _make_tap_kernel(taps, Wp, Fpad, _roll_is_jnp_convention())

    flops = 2 * N * G * T * OCg_pad * Cg_pad * Fpad
    bytes_accessed = (xf.size * xf.dtype.itemsize        # activations, read once
                      + wk.size * wk.dtype.itemsize      # weights (NOT x N)
                      + N * G * OCg_pad * Fpad * 4)      # f32 output

    out = pl.pallas_call(
        kernel,
        out_shape=jax.ShapeDtypeStruct((N, G, OCg_pad, Fpad), jnp.float32),
        grid=grid,
        in_specs=[
            pl.BlockSpec((None, None, tcg, Fpad),
                         lambda n, g, oc, cg: (n, g, cg, 0)),
            pl.BlockSpec((None, T, toc, tcg),
                         lambda n, g, oc, cg: (g, 0, oc, cg)),
        ],
        out_specs=pl.BlockSpec((None, None, toc, Fpad),
                               lambda n, g, oc, cg: (n, g, oc, 0)),
        scratch_shapes=[pltpu.VMEM((toc, Fpad), jnp.float32)],
        compiler_params=pltpu.CompilerParams(
            dimension_semantics=("parallel", "parallel", "parallel", "arbitrary"),
            vmem_limit_bytes=vmem_limit,
        ),
        cost_estimate=pl.CostEstimate(
            flops=flops, transcendentals=0, bytes_accessed=bytes_accessed),
    )(xf, wk)

    # Crop the flat padded-plane output back to the (strided) conv output, NCHW.
    out = out[:, :, :OCg, :F].reshape(N, G, OCg, Hp, Wp)[:, :, :, :Ho1, :Wo1]
    if sh > 1 or sw > 1:
        out = out[:, :, :, ::sh, ::sw]
    return out.reshape(N, OC, Ho, Wo).astype(x.dtype)


# --------------------------------- wrapper --------------------------------- #
def conv2d_wrapper(x, w, stride=1, padding=0, groups=1,
                   transpose=False, flip_weight=True):
    """Mirror of torch `_conv2d_wrapper` forward semantics (NCHW)."""
    if not flip_weight:
        # conv2d performs correlation; flip_weight=False requests true convolution.
        w = w[:, :, ::-1, ::-1]

    if not transpose:
        return _conv2d_fused(x, w, stride, padding, groups)

    # conv_transpose2d(x, w, stride, padding, groups); w: [IC, OC/G, KH, KW].
    # Rewritten as a stride-1 forward conv on an interior-dilated input whose
    # edges are padded by (K-1-p); lax.pad handles negative edge pad (crop).
    IC, OCg, KH, KW = w.shape
    G = int(groups)
    sh, sw = _pair(stride)
    ph, pw = _pair(padding)
    Cg = IC // G
    w_eq = w.reshape(G, Cg, OCg, KH, KW).transpose(0, 2, 1, 3, 4)
    w_eq = w_eq.reshape(G * OCg, Cg, KH, KW)[:, :, ::-1, ::-1]

    eh, ew = KH - 1 - ph, KW - 1 - pw
    xd = lax.pad(x, jnp.zeros((), x.dtype),
                 ((0, 0, 0), (0, 0, 0), (eh, eh, sh - 1), (ew, ew, sw - 1)))
    return _conv2d_fused(xd, w_eq, 1, 0, G)


# ----------------------------------- main ----------------------------------- #
if __name__ == "__main__":
    key = jax.random.PRNGKey(0)
    kx, kw = jax.random.split(key)

    # Module config: w_shape = [out_channels=8, in_channels=4, 3, 3]
    N, C, H, W = 2, 4, 16, 16
    OC, KH, KW = 8, 3, 3
    x = jax.random.normal(kx, (N, C, H, W), dtype=jnp.float32)
    weight = jax.random.normal(kw, (OC, C, KH, KW), dtype=jnp.float32)

    # forward(x, stride=1, padding=1, groups=1, transpose=False, flip_weight=True)
    y = conv2d_wrapper(x, weight, stride=1, padding=1, groups=1,
                       transpose=False, flip_weight=True)
    y = jax.block_until_ready(y)
    assert y.shape == (N, OC, H, W), y.shape

    # Reference with matching bf16 operand precision (f32 accumulation); same
    # semantics as torch.nn.functional.conv2d.
    ref = lax.conv_general_dilated(
        x.astype(jnp.bfloat16), weight.astype(jnp.bfloat16),
        window_strides=(1, 1), padding=((1, 1), (1, 1)),
        dimension_numbers=("NCHW", "OIHW", "NCHW"), feature_group_count=1,
        preferred_element_type=jnp.float32)
    np.testing.assert_allclose(np.asarray(y), np.asarray(ref),
                               rtol=2e-2, atol=2e-2)

    print("KERNEL_OK")
</pallas_src>

<mosaic_0001>
module attributes {stable_mosaic.version = 11 : i64} {
  func.func @probe(%arg0: memref<8x128xi32, #tpu.memory_space<vmem>>, %arg1: memref<8x128xi32, #tpu.memory_space<vmem>>) attributes {dimension_semantics = [], scalar_prefetch = 0 : i64, scratch_operands = 0 : i64, tpu.core_type = #tpu.core_type<tc>} {
    %c0 = arith.constant 0 : index
    %c0_0 = arith.constant 0 : index
    %0 = vector.load %arg0[%c0, %c0_0] : memref<8x128xi32, #tpu.memory_space<vmem>>, vector<8x128xi32>
    %c1_i32 = arith.constant 1 : i32
    %1 = tpu.dynamic_rotate %0 by %c1_i32 dim 1 : vector<8x128xi32>, i32 -> vector<8x128xi32>
    %c0_1 = arith.constant 0 : index
    %c0_2 = arith.constant 0 : index
    %2 = vector.load %arg1[%c0_1, %c0_2] : memref<8x128xi32, #tpu.memory_space<vmem>>, vector<8x128xi32>
    tpu.vector_store %arg1[%c0_1, %c0_2], %1 {strides = array<i32>} : memref<8x128xi32, #tpu.memory_space<vmem>>, vector<8x128xi32>,
    return
  }
}

</mosaic_0001>

<bundles_post_ra>
// kernel: tpu_custom_call.1
= control target key start
LH: loop header
LB: loop body
LE: loop exit
PB: predicated region body
PF: predicated region fallthrough
CT: control target
= control target key end

     0   :  { %6 = vsyncpa [#allocation3], 0  ;;  %s128_s0 = inlined_call_operand.hbm [shape: s32[8,128], index: 0, kind: input, shape index: {}]   ;;  %s129_s1 = inlined_call_operand.hbm [shape: s32[8,128], index: 1, kind: output, shape index: {}]  }
   0x1   :  { %7 = vsyncpa [#allocation4], 0  ;;  %s91_s6 = smov [#allocation2]   ;;  %s43_s10 = scalar_lea.hbm %s128_s0, 128 }
   0x2   :  { %s14_s7 = sshll.u32 %s91_s6, 4  ;;  %p44_p0 = scmp.ne.s32.totalorder %s128_s0, %s43_s10  ;;  %s15_s7 = int_to_ptr.vmem [resolvable:$true] %s14_s7 }
   0x3   :  { %p47_p1 = scmp.lt.u32.totalorder %s43_s10, %s128_s0 }
   0x5   :  { %p49_p2 = pnand %p47_p1, %p44_p0 }
   0x7   :  { %52 = shalt.err (!%p49_p2)
}
   0x8   :  { %s53_s15 = scalar_lea.vmem %s15_s7, 128  ;;  %p58_p4 = scmp.lt.s32.totalorder %s15_s7, %s15_s7 }
   0x9   :  { %p54_p3 = scmp.ne.s32.totalorder %s15_s7, %s53_s15  ;;  %p59_p5 = scmp.lt.s32.totalorder %s53_s15, %s53_s15 }
   0xb   :  { %p60_p6 = por %p59_p5, %p58_p4 }
   0xd   :  { %p61_p7 = pnand %p60_p6, %p54_p3 }
   0xf   :  { %64 = shalt.err (!%p61_p7)
}
  0x10   :  { %17 = dma.hbm_to_vmem [thread:$0]  %s128_s0, 128, %s15_s7, [#allocation3]  }
  0x11   :  { %87 = dma.done.wait [#allocation3], 128  }
  0x12   :  { %88 = vsyncadd [#allocation3], 4294967168  ;;  %v21_v0 = vld [vmem:[#allocation2] sm:$0xff]  ;;  %s92_s18 = smov 1   ;;  %s93_s19 = smov [#allocation5]  }
  0x13   :  { %22 = vrot.lane.b32.xlu0 %v21_v0, %s92_s18  ;;  %s31_s20 = sshll.u32 %s93_s19, 4  ;;  %s32_s20 = int_to_ptr.vmem [resolvable:$true] %s31_s20 }
  0x14   :  { %s65_s21 = scalar_lea.vmem %s32_s20, 128  ;;  %p70_p9 = scmp.lt.s32.totalorder %s32_s20, %s32_s20 }
  0x15   :  { %p66_p8 = scmp.ne.s32.totalorder %s32_s20, %s65_s21  ;;  %p71_p10 = scmp.lt.s32.totalorder %s65_s21, %s65_s21 }
  0x17   :  { %p72_p11 = por %p71_p10, %p70_p9 }
  0x19   :  { %p73_p12 = pnand %p72_p11, %p66_p8 }
  0x85   :  { %v23_v1 = vpop.permute.xlu0 %22 }
  0x86   :  { %24 = vst [vmem:[#allocation5] sm:$0xff] %v23_v1 }
  0x87   :  { %76 = shalt.err (!%p73_p12)
}
  0x88   :  { %s77_s0 = scalar_lea.hbm %s129_s1, 128 }
  0x89   :  { %p78_p13 = scmp.ne.s32.totalorder %s129_s1, %s77_s0  ;;  %p81_p0 = scmp.lt.u32.totalorder %s77_s0, %s129_s1 }
  0x8b   :  { %p83_p1 = pnand %p81_p0, %p78_p13 }
  0x8d   :  { %86 = shalt.err (!%p83_p1)
}
  0x8e   :  { %34 = dma.vmem_to_hbm [thread:$0]  %s32_s20, 128, %s129_s1, [#allocation4]  }
  0x8f   :  { %89 = dma.done.wait [#allocation4], 128  }
  0x90   :  { %90 = vsyncadd [#allocation4], 4294967168 }
  0x91   :  { %38 = vsyncpa [#allocation3], 1 }
  0x92   :  { %39 = vsyncpa [#allocation4], 1 }

</bundles_post_ra>
